<compile_context>
chip_gen: v7x
topology: tpu7x:2x2x1
jax: 0.10.0
libtpu: 0.0.40
codegen_flags: <defaults>
</compile_context>

<pallas_src>
import functools

import jax
import jax.numpy as jnp
from jax import lax
from jax.experimental import pallas as pl
from jax.experimental.pallas import tpu as pltpu


def _round_up(x, m):
    return (x + m - 1) // m * m


def _cdiv(a, b):
    return -(-a // b)


def _vmem_capacity_bytes():
    """Per-core VMEM capacity; falls back to 128 MiB if the query is unavailable."""
    try:
        info = pltpu.get_tpu_info()
        cap = getattr(info, "vmem_capacity_bytes", None)
        if cap:
            return int(cap)
    except Exception:
        pass
    return 128 << 20


def _layernorm(x, gamma, beta, inv_d, eps=1e-5):
    """LayerNorm over the last axis of a lane-padded f32 tile.

    Padded lanes of x are zero and padded lanes of gamma/beta are zero, so sums over
    all lanes equal sums over the true feature dim; dividing by the true dim (inv_d)
    reproduces PyTorch nn.LayerNorm (biased variance, eps inside the sqrt).
    """
    s1 = jnp.sum(x, axis=-1, keepdims=True)
    s2 = jnp.sum(x * x, axis=-1, keepdims=True)
    mu = s1 * inv_d
    var = jnp.maximum(s2 * inv_d - mu * mu, 0.0)
    return (x - mu) * lax.rsqrt(var + eps) * gamma + beta


def actor_kernel(
    x_ref,        # (tile_b, dp_in)   bf16 (streamed) or f32
    ln1_ref,      # (2, dp_in)        rows: [gamma1, beta1]            f32
    w1_ref,       # (dp_in, dp_h1)    bf16 or f32
    ln2b1_ref,    # (3, dp_h1)        rows: [gamma2, beta2, bias_a1]   f32
    w2_ref,       # (dp_h1, dp_h2)    bf16 or f32
    b2_ref,       # (1, dp_h2)        f32
    w3_ref,       # (dp_h2, d_act)    bf16 or f32  (output dim NOT padded)
    b3_ref,       # (1, d_act)        f32
    out_ref,      # (tile_b, d_act)   f32
    *, inv_d_in, inv_d_h1,
):
    # Upcast the (possibly bf16) streamed input to f32 for the LayerNorm math.
    x = x_ref[...].astype(jnp.float32)

    # --- block 1: LayerNorm(input) -> Linear_a1 -> ReLU ---
    xn = _layernorm(x, ln1_ref[0:1, :], ln1_ref[1:2, :], inv_d_in)
    h1 = jnp.dot(xn.astype(w1_ref.dtype), w1_ref[...],
                 preferred_element_type=jnp.float32) + ln2b1_ref[2:3, :]
    h1 = jnp.maximum(h1, 0.0)

    # --- block 2: LayerNorm(h1) -> Linear_a2 -> ReLU ---
    h1n = _layernorm(h1, ln2b1_ref[0:1, :], ln2b1_ref[1:2, :], inv_d_h1)
    h2 = jnp.dot(h1n.astype(w2_ref.dtype), w2_ref[...],
                 preferred_element_type=jnp.float32) + b2_ref[...]
    h2 = jnp.maximum(h2, 0.0)

    # --- output head: Linear_a (no activation; policy_adj == policy) ---
    policy = jnp.dot(h2.astype(w3_ref.dtype), w3_ref[...],
                     preferred_element_type=jnp.float32) + b3_ref[...]
    out_ref[...] = policy.astype(out_ref.dtype)


def actor_forward(x, params, *, tile_b=None, use_bf16=True, single_buffer_weights=True):
    """Fused actor forward pass as a single Pallas kernel."""
    B, d_in = x.shape
    (g1, b1, w1, bw1, g2, b2, w2, bw2, w3, bw3) = params
    d_h1 = w1.shape[1]
    d_h2 = w2.shape[1]
    d_act = w3.shape[1]

    # ---- lane-pad the matmul-contracted feature dims to multiples of 128 ----
    dp_in = _round_up(d_in, 128)
    dp_h1 = _round_up(d_h1, 128)
    dp_h2 = _round_up(d_h2, 128)
    # Output dim stays at the true action size (block dim == full array dim is legal);
    # for small action sizes this cuts output HBM bytes ~8x vs 128-lane padding.

    # ---- batch tiling: nearly-full last tile, VMEM-capacity-aware max tile ----
    vmem_cap = _vmem_capacity_bytes()
    bp0 = _round_up(max(B, 1), 8)
    if tile_b is None:
        max_tile = 1024 if vmem_cap >= (100 << 20) else 512   # 128 MiB parts vs v7x
        # On small-VMEM (v7x-like, 2 TensorCore) parts give the grid >=2 parallel
        # tiles for mid-size batches so the second core does not idle.
        if vmem_cap < (100 << 20) and bp0 >= 128:
            max_tile = min(max_tile, _round_up(_cdiv(bp0, 2), 8))
        n_tiles = _cdiv(bp0, max_tile)
        tile_b = _round_up(_cdiv(bp0, n_tiles), 8)
    else:
        tile_b = max(8, _round_up(min(tile_b, bp0), 8))
    bp = _round_up(bp0, tile_b)
    grid = (bp // tile_b,)

    def pad2(a, r, c):
        if a.shape == (r, c):
            return a                      # skip the extra HBM pass when already aligned
        return jnp.pad(a, ((0, r - a.shape[0]), (0, c - a.shape[1])))

    x_dtype = jnp.bfloat16 if use_bf16 else jnp.float32
    x_p = pad2(x.astype(x_dtype), bp, dp_in)

    # Packed per-layer vectors (all f32; pads MUST be zero for the LayerNorm trick
    # and to keep padded lanes of h1/h2 exactly zero).
    ln1_p = jnp.concatenate([pad2(g1, 1, dp_in), pad2(b1, 1, dp_in)], axis=0)      # (2, dp_in)
    ln2b1_p = jnp.concatenate(
        [pad2(g2, 1, dp_h1), pad2(b2, 1, dp_h1), pad2(bw1, 1, dp_h1)], axis=0)     # (3, dp_h1)
    bw2_p = pad2(bw2, 1, dp_h2)                                                     # (1, dp_h2)
    bw3_p = bw3.astype(jnp.float32)                                                 # (1, d_act)

    w_dtype = jnp.bfloat16 if use_bf16 else jnp.float32
    w1_p = pad2(w1, dp_in, dp_h1).astype(w_dtype)
    w2_p = pad2(w2, dp_h1, dp_h2).astype(w_dtype)
    w3_p = pad2(w3, dp_h2, d_act).astype(w_dtype)   # pad K rows only; N stays d_act

    kernel = functools.partial(
        actor_kernel, inv_d_in=1.0 / float(d_in), inv_d_h1=1.0 / float(d_h1)
    )

    # ---- advisory cost estimate ----
    flops = 2 * bp * (dp_in * dp_h1 + dp_h1 * dp_h2 + dp_h2 * d_act)
    transcendentals = 2 * bp  # two rsqrt per row
    bytes_accessed = int(
        x_p.nbytes + bp * d_act * 4
        + w1_p.nbytes + w2_p.nbytes + w3_p.nbytes
        + ln1_p.nbytes + ln2b1_p.nbytes + bw2_p.nbytes + bw3_p.nbytes
    )

    # ---- VMEM budget: pipeline buffers + resident weights + in-kernel intermediates ----
    wbytes = 2 if use_bf16 else 4
    xbytes = 2 if use_bf16 else 4
    wbufs = 1 if single_buffer_weights else 2
    vmem_need = (
        2 * tile_b * dp_in * xbytes                                   # x (double-buffered)
        + 2 * tile_b * d_act * 4                                      # out (double-buffered)
        + wbufs * wbytes * (dp_in * dp_h1 + dp_h1 * dp_h2 + dp_h2 * d_act)  # weights
        + wbufs * 4 * (2 * dp_in + 3 * dp_h1 + dp_h2 + d_act)         # packed vectors
        + tile_b * 4 * (2 * dp_in + 3 * dp_h1 + 3 * dp_h2 + d_act)    # xn/h1/h1n/h2 + casts
    )
    vmem_limit = int(min(max(int(1.3 * vmem_need), 8 << 20), int(0.85 * vmem_cap)))

    def run(weight_mode):
        def const(shape):
            if weight_mode is None:
                return pl.BlockSpec(shape, lambda i: (0, 0))
            return pl.BlockSpec(shape, lambda i: (0, 0), pipeline_mode=weight_mode)

        return pl.pallas_call(
            kernel,
            out_shape=jax.ShapeDtypeStruct((bp, d_act), jnp.float32),
            grid_spec=pltpu.PrefetchScalarGridSpec(
                num_scalar_prefetch=0,
                grid=grid,
                in_specs=[
                    pl.BlockSpec((tile_b, dp_in), lambda i: (i, 0)),   # x
                    const((2, dp_in)),                                  # [gamma1; beta1]
                    const((dp_in, dp_h1)),                              # W1
                    const((3, dp_h1)),                                  # [gamma2; beta2; bias1]
                    const((dp_h1, dp_h2)),                              # W2
                    const((1, dp_h2)),                                  # bias2
                    const((dp_h2, d_act)),                              # W3
                    const((1, d_act)),                                  # bias3
                ],
                out_specs=pl.BlockSpec((tile_b, d_act), lambda i: (i, 0)),
            ),
            compiler_params=pltpu.CompilerParams(
                dimension_semantics=("parallel",),        # batch tiles shard across cores
                vmem_limit_bytes=vmem_limit,
            ),
            cost_estimate=pl.CostEstimate(
                flops=flops,
                transcendentals=transcendentals,
                bytes_accessed=bytes_accessed,
            ),
        )(x_p, ln1_p, w1_p, ln2b1_p, w2_p, bw2_p, w3_p, bw3_p)

    out_p = None
    if single_buffer_weights:
        try:
            # Grid-invariant operands: one buffer is enough (constant index map).
            out_p = run(pl.Buffered(1))
        except Exception:
            out_p = None                     # fall back to default double-buffering
    if out_p is None:
        out_p = run(None)

    # rows-only slice (no-op when B is already tile-aligned); lanes are already d_act
    return out_p[:B]


def init_params(key, num_inputs, num_units_1, num_units_2, action_size):
    """Deterministic synthetic parameters, mimicking actor_agent.__init__/reset_parameters."""
    gain_lrelu = jnp.sqrt(2.0 / (1.0 + 0.01 ** 2))   # nn.init.calculate_gain('leaky_relu')
    gain_tanh = 5.0 / 3.0                            # nn.init.calculate_gain('tanh')

    ks = jax.random.split(key, 6)

    def linear(kw, kb, fan_in, fan_out, gain):
        bound = 1.0 / jnp.sqrt(fan_in)
        # weight stored transposed: (in, out)
        w = jax.random.uniform(kw, (fan_in, fan_out), jnp.float32, -bound, bound) * gain
        b = jax.random.uniform(kb, (1, fan_out), jnp.float32, -bound, bound)
        return w, b

    w1, bw1 = linear(ks[0], ks[1], num_inputs, num_units_1, gain_lrelu)
    w2, bw2 = linear(ks[2], ks[3], num_units_1, num_units_2, gain_lrelu)
    w3, bw3 = linear(ks[4], ks[5], num_units_2, action_size, gain_tanh)

    # LayerNorm affine params init like PyTorch: gamma=1, beta=0
    g1 = jnp.ones((1, num_inputs), jnp.float32)
    b1 = jnp.zeros((1, num_inputs), jnp.float32)
    g2 = jnp.ones((1, num_units_1), jnp.float32)
    b2 = jnp.zeros((1, num_units_1), jnp.float32)

    return (g1, b1, w1, bw1, g2, b2, w2, bw2, w3, bw3)


def reference_forward(x, params):
    """Plain-JAX f32 reference matching the PyTorch forward semantics."""
    (g1, b1, w1, bw1, g2, b2, w2, bw2, w3, bw3) = params

    def ln(v, g, b, eps=1e-5):
        mu = jnp.mean(v, axis=-1, keepdims=True)
        var = jnp.mean((v - mu) * (v - mu), axis=-1, keepdims=True)
        return (v - mu) / jnp.sqrt(var + eps) * g + b

    xn = ln(x, g1, b1)
    h1 = jnp.maximum(xn @ w1 + bw1, 0.0)
    h1n = ln(h1, g2, b2)
    h2 = jnp.maximum(h1n @ w2 + bw2, 0.0)
    return h2 @ w3 + bw3


if __name__ == "__main__":
    # small shapes consistent with the module's forward:
    # input (B, num_inputs); hidden units from args.num_units_1/2; action_size output
    B = 8
    num_inputs = 32
    num_units_1 = 64
    num_units_2 = 64
    action_size = 16

    key = jax.random.PRNGKey(0)
    kx, kp = jax.random.split(key)
    x = jax.random.normal(kx, (B, num_inputs), jnp.float32)
    params = init_params(kp, num_inputs, num_units_1, num_units_2, action_size)

    ref = reference_forward(x, params)

    # f32 MXU path: tight tolerance
    policy_f32 = jax.block_until_ready(actor_forward(x, params, use_bf16=False))
    assert policy_f32.shape == (B, action_size)
    assert jnp.allclose(policy_f32, ref, atol=1e-4, rtol=1e-4), "f32 mismatch vs reference"

    # bf16 MXU path (default): bf16 weights + bf16 input stream, f32 accumulation
    policy_bf16 = jax.block_until_ready(actor_forward(x, params, use_bf16=True))
    assert policy_bf16.shape == (B, action_size)
    assert jnp.allclose(policy_bf16, ref, atol=1e-1, rtol=1e-1), "bf16 mismatch vs reference"

    print("KERNEL_OK")
</pallas_src>

<mosaic_0001>
module attributes {stable_mosaic.version = 11 : i64} {
  func.func @actor_kernel(%arg0: i32, %arg1: memref<8x128xf32, #tpu.memory_space<vmem>>, %arg2: memref<2x128xf32, #tpu.memory_space<vmem>>, %arg3: memref<128x128xf32, #tpu.memory_space<vmem>>, %arg4: memref<3x128xf32, #tpu.memory_space<vmem>>, %arg5: memref<128x128xf32, #tpu.memory_space<vmem>>, %arg6: memref<1x128xf32, #tpu.memory_space<vmem>>, %arg7: memref<128x16xf32, #tpu.memory_space<vmem>>, %arg8: memref<1x16xf32, #tpu.memory_space<vmem>>, %arg9: memref<8x16xf32, #tpu.memory_space<vmem>>) attributes {dimension_semantics = [#tpu.dimension_semantics<parallel>], iteration_bounds = array<i64: 1>, scalar_prefetch = 0 : i64, scratch_operands = 0 : i64, tpu.core_type = #tpu.core_type<tc>, window_params = [{transform_indices = @transform_0, window_bounds = array<i64: 8, 128>}, {pipeline_mode = #tpu.pipeline_mode<synchronous>, transform_indices = @transform_1, window_bounds = array<i64: 2, 128>}, {pipeline_mode = #tpu.pipeline_mode<synchronous>, transform_indices = @transform_2, window_bounds = array<i64: 128, 128>}, {pipeline_mode = #tpu.pipeline_mode<synchronous>, transform_indices = @transform_3, window_bounds = array<i64: 3, 128>}, {pipeline_mode = #tpu.pipeline_mode<synchronous>, transform_indices = @transform_4, window_bounds = array<i64: 128, 128>}, {pipeline_mode = #tpu.pipeline_mode<synchronous>, transform_indices = @transform_5, window_bounds = array<i64: 1, 128>}, {pipeline_mode = #tpu.pipeline_mode<synchronous>, transform_indices = @transform_6, window_bounds = array<i64: 128, 16>}, {pipeline_mode = #tpu.pipeline_mode<synchronous>, transform_indices = @transform_7, window_bounds = array<i64: 1, 16>}, {transform_indices = @transform_8, window_bounds = array<i64: 8, 16>}]} {
    %c0 = arith.constant 0 : index
    %c0_0 = arith.constant 0 : index
    %0 = vector.load %arg1[%c0, %c0_0] : memref<8x128xf32, #tpu.memory_space<vmem>>, vector<8x128xf32>
    %c0_1 = arith.constant 0 : index
    %c0_2 = arith.constant 0 : index
    %1 = vector.load %arg2[%c0_1, %c0_2] : memref<2x128xf32, #tpu.memory_space<vmem>>, vector<1x128xf32>
    %c1 = arith.constant 1 : index
    %c0_3 = arith.constant 0 : index
    %2 = vector.load %arg2[%c1, %c0_3] : memref<2x128xf32, #tpu.memory_space<vmem>>, vector<1x128xf32>
    %cst = arith.constant dense<0.000000e+00> : vector<8xf32>
    %3 = vector.multi_reduction <add>, %0, %cst [1] : vector<8x128xf32> to vector<8xf32>
    %4 = vector.shape_cast %3 : vector<8xf32> to vector<8x1xf32>
    %5 = arith.mulf %0, %0 : vector<8x128xf32>
    %cst_4 = arith.constant dense<0.000000e+00> : vector<8xf32>
    %6 = vector.multi_reduction <add>, %5, %cst_4 [1] : vector<8x128xf32> to vector<8xf32>
    %7 = vector.shape_cast %6 : vector<8xf32> to vector<8x1xf32>
    %cst_5 = arith.constant 3.125000e-02 : f32
    %8 = vector.broadcast %cst_5 : f32 to vector<8x1xf32>
    %9 = arith.mulf %4, %8 : vector<8x1xf32>
    %cst_6 = arith.constant 3.125000e-02 : f32
    %10 = vector.broadcast %cst_6 : f32 to vector<8x1xf32>
    %11 = arith.mulf %7, %10 : vector<8x1xf32>
    %12 = arith.mulf %9, %9 : vector<8x1xf32>
    %13 = arith.subf %11, %12 : vector<8x1xf32>
    %cst_7 = arith.constant 0.000000e+00 : f32
    %14 = vector.broadcast %cst_7 : f32 to vector<8x1xf32>
    %15 = arith.maximumf %13, %14 : vector<8x1xf32>
    %16 = vector.broadcast %9 : vector<8x1xf32> to vector<8x128xf32>
    %17 = arith.subf %0, %16 : vector<8x128xf32>
    %cst_8 = arith.constant 9.99999974E-6 : f32
    %18 = vector.broadcast %cst_8 : f32 to vector<8x1xf32>
    %19 = arith.addf %15, %18 : vector<8x1xf32>
    %20 = math.rsqrt %19 : vector<8x1xf32>
    %21 = vector.broadcast %20 : vector<8x1xf32> to vector<8x128xf32>
    %22 = arith.mulf %17, %21 : vector<8x128xf32>
    %23 = vector.broadcast %1 : vector<1x128xf32> to vector<8x128xf32>
    %24 = arith.mulf %22, %23 : vector<8x128xf32>
    %25 = vector.broadcast %2 : vector<1x128xf32> to vector<8x128xf32>
    %26 = arith.addf %24, %25 : vector<8x128xf32>
    %c0_9 = arith.constant 0 : index
    %c0_10 = arith.constant 0 : index
    %27 = vector.load %arg3[%c0_9, %c0_10] : memref<128x128xf32, #tpu.memory_space<vmem>>, vector<128x128xf32>
    %cst_11 = arith.constant dense<0.000000e+00> : vector<8x128xf32>
    %28 = tpu.matmul %26, %27, %cst_11 {dimension_numbers = #tpu.dot_dimension_numbers<[1], [0], [0], [1], [0, 0, 1, 1], [], []>} : vector<8x128xf32>, vector<128x128xf32>, vector<8x128xf32> -> vector<8x128xf32>
    %c2 = arith.constant 2 : index
    %c0_12 = arith.constant 0 : index
    %29 = vector.load %arg4[%c2, %c0_12] : memref<3x128xf32, #tpu.memory_space<vmem>>, vector<1x128xf32>
    %30 = vector.broadcast %29 : vector<1x128xf32> to vector<8x128xf32>
    %31 = arith.addf %28, %30 : vector<8x128xf32>
    %cst_13 = arith.constant 0.000000e+00 : f32
    %32 = vector.broadcast %cst_13 : f32 to vector<8x128xf32>
    %33 = arith.maximumf %31, %32 : vector<8x128xf32>
    %c0_14 = arith.constant 0 : index
    %c0_15 = arith.constant 0 : index
    %34 = vector.load %arg4[%c0_14, %c0_15] : memref<3x128xf32, #tpu.memory_space<vmem>>, vector<1x128xf32>
    %c1_16 = arith.constant 1 : index
    %c0_17 = arith.constant 0 : index
    %35 = vector.load %arg4[%c1_16, %c0_17] : memref<3x128xf32, #tpu.memory_space<vmem>>, vector<1x128xf32>
    %cst_18 = arith.constant dense<0.000000e+00> : vector<8xf32>
    %36 = vector.multi_reduction <add>, %33, %cst_18 [1] : vector<8x128xf32> to vector<8xf32>
    %37 = vector.shape_cast %36 : vector<8xf32> to vector<8x1xf32>
    %38 = arith.mulf %33, %33 : vector<8x128xf32>
    %cst_19 = arith.constant dense<0.000000e+00> : vector<8xf32>
    %39 = vector.multi_reduction <add>, %38, %cst_19 [1] : vector<8x128xf32> to vector<8xf32>
    %40 = vector.shape_cast %39 : vector<8xf32> to vector<8x1xf32>
    %cst_20 = arith.constant 1.562500e-02 : f32
    %41 = vector.broadcast %cst_20 : f32 to vector<8x1xf32>
    %42 = arith.mulf %37, %41 : vector<8x1xf32>
    %cst_21 = arith.constant 1.562500e-02 : f32
    %43 = vector.broadcast %cst_21 : f32 to vector<8x1xf32>
    %44 = arith.mulf %40, %43 : vector<8x1xf32>
    %45 = arith.mulf %42, %42 : vector<8x1xf32>
    %46 = arith.subf %44, %45 : vector<8x1xf32>
    %cst_22 = arith.constant 0.000000e+00 : f32
    %47 = vector.broadcast %cst_22 : f32 to vector<8x1xf32>
    %48 = arith.maximumf %46, %47 : vector<8x1xf32>
    %49 = vector.broadcast %42 : vector<8x1xf32> to vector<8x128xf32>
    %50 = arith.subf %33, %49 : vector<8x128xf32>
    %cst_23 = arith.constant 9.99999974E-6 : f32
    %51 = vector.broadcast %cst_23 : f32 to vector<8x1xf32>
    %52 = arith.addf %48, %51 : vector<8x1xf32>
    %53 = math.rsqrt %52 : vector<8x1xf32>
    %54 = vector.broadcast %53 : vector<8x1xf32> to vector<8x128xf32>
    %55 = arith.mulf %50, %54 : vector<8x128xf32>
    %56 = vector.broadcast %34 : vector<1x128xf32> to vector<8x128xf32>
    %57 = arith.mulf %55, %56 : vector<8x128xf32>
    %58 = vector.broadcast %35 : vector<1x128xf32> to vector<8x128xf32>
    %59 = arith.addf %57, %58 : vector<8x128xf32>
    %c0_24 = arith.constant 0 : index
    %c0_25 = arith.constant 0 : index
    %60 = vector.load %arg5[%c0_24, %c0_25] : memref<128x128xf32, #tpu.memory_space<vmem>>, vector<128x128xf32>
    %cst_26 = arith.constant dense<0.000000e+00> : vector<8x128xf32>
    %61 = tpu.matmul %59, %60, %cst_26 {dimension_numbers = #tpu.dot_dimension_numbers<[1], [0], [0], [1], [0, 0, 1, 1], [], []>} : vector<8x128xf32>, vector<128x128xf32>, vector<8x128xf32> -> vector<8x128xf32>
    %c0_27 = arith.constant 0 : index
    %c0_28 = arith.constant 0 : index
    %62 = vector.load %arg6[%c0_27, %c0_28] : memref<1x128xf32, #tpu.memory_space<vmem>>, vector<1x128xf32>
    %63 = vector.broadcast %62 : vector<1x128xf32> to vector<8x128xf32>
    %64 = arith.addf %61, %63 : vector<8x128xf32>
    %cst_29 = arith.constant 0.000000e+00 : f32
    %65 = vector.broadcast %cst_29 : f32 to vector<8x128xf32>
    %66 = arith.maximumf %64, %65 : vector<8x128xf32>
    %c0_30 = arith.constant 0 : index
    %c0_31 = arith.constant 0 : index
    %67 = vector.load %arg7[%c0_30, %c0_31] : memref<128x16xf32, #tpu.memory_space<vmem>>, vector<128x16xf32>
    %cst_32 = arith.constant dense<0.000000e+00> : vector<8x16xf32>
    %68 = tpu.matmul %66, %67, %cst_32 {dimension_numbers = #tpu.dot_dimension_numbers<[1], [0], [0], [1], [0, 0, 1, 1], [], []>} : vector<8x128xf32>, vector<128x16xf32>, vector<8x16xf32> -> vector<8x16xf32>
    %c0_33 = arith.constant 0 : index
    %c0_34 = arith.constant 0 : index
    %69 = vector.load %arg8[%c0_33, %c0_34] : memref<1x16xf32, #tpu.memory_space<vmem>>, vector<1x16xf32>
    %70 = vector.broadcast %69 : vector<1x16xf32> to vector<8x16xf32>
    %71 = arith.addf %68, %70 : vector<8x16xf32>
    %c0_35 = arith.constant 0 : index
    %c0_36 = arith.constant 0 : index
    %72 = vector.load %arg9[%c0_35, %c0_36] : memref<8x16xf32, #tpu.memory_space<vmem>>, vector<8x16xf32>
    tpu.vector_store %arg9[%c0_35, %c0_36], %71 {strides = array<i32>} : memref<8x16xf32, #tpu.memory_space<vmem>>, vector<8x16xf32>,
    return
  }
  func.func @transform_0(%arg0: i32) -> (i32, i32) {
    %c0_i32 = arith.constant 0 : i32
    %c0_i32_0 = arith.constant 0 : i32
    return %arg0, %c0_i32 : i32, i32
  }
  func.func @transform_1(%arg0: i32) -> (i32, i32) {
    %c0_i32 = arith.constant 0 : i32
    %c0_i32_0 = arith.constant 0 : i32
    %c0_i32_1 = arith.constant 0 : i32
    return %c0_i32, %c0_i32_0 : i32, i32
  }
  func.func @transform_2(%arg0: i32) -> (i32, i32) {
    %c0_i32 = arith.constant 0 : i32
    %c0_i32_0 = arith.constant 0 : i32
    %c0_i32_1 = arith.constant 0 : i32
    return %c0_i32, %c0_i32_0 : i32, i32
  }
  func.func @transform_3(%arg0: i32) -> (i32, i32) {
    %c0_i32 = arith.constant 0 : i32
    %c0_i32_0 = arith.constant 0 : i32
    %c0_i32_1 = arith.constant 0 : i32
    return %c0_i32, %c0_i32_0 : i32, i32
  }
  func.func @transform_4(%arg0: i32) -> (i32, i32) {
    %c0_i32 = arith.constant 0 : i32
    %c0_i32_0 = arith.constant 0 : i32
    %c0_i32_1 = arith.constant 0 : i32
    return %c0_i32, %c0_i32_0 : i32, i32
  }
  func.func @transform_5(%arg0: i32) -> (i32, i32) {
    %c0_i32 = arith.constant 0 : i32
    %c0_i32_0 = arith.constant 0 : i32
    %c0_i32_1 = arith.constant 0 : i32
    return %c0_i32, %c0_i32_0 : i32, i32
  }
  func.func @transform_6(%arg0: i32) -> (i32, i32) {
    %c0_i32 = arith.constant 0 : i32
    %c0_i32_0 = arith.constant 0 : i32
    %c0_i32_1 = arith.constant 0 : i32
    return %c0_i32, %c0_i32_0 : i32, i32
  }
  func.func @transform_7(%arg0: i32) -> (i32, i32) {
    %c0_i32 = arith.constant 0 : i32
    %c0_i32_0 = arith.constant 0 : i32
    %c0_i32_1 = arith.constant 0 : i32
    return %c0_i32, %c0_i32_0 : i32, i32
  }
  func.func @transform_8(%arg0: i32) -> (i32, i32) {
    %c0_i32 = arith.constant 0 : i32
    %c0_i32_0 = arith.constant 0 : i32
    return %arg0, %c0_i32 : i32, i32
  }
}

module attributes {stable_mosaic.version = 11 : i64} {
  func.func @actor_kernel(%arg0: i32, %arg1: memref<8x128xf32, #tpu.memory_space<vmem>>, %arg2: memref<2x128xf32, #tpu.memory_space<vmem>>, %arg3: memref<128x128xf32, #tpu.memory_space<vmem>>, %arg4: memref<3x128xf32, #tpu.memory_space<vmem>>, %arg5: memref<128x128xf32, #tpu.memory_space<vmem>>, %arg6: memref<1x128xf32, #tpu.memory_space<vmem>>, %arg7: memref<128x16xf32, #tpu.memory_space<vmem>>, %arg8: memref<1x16xf32, #tpu.memory_space<vmem>>, %arg9: memref<8x16xf32, #tpu.memory_space<vmem>>) attributes {dimension_semantics = [#tpu.dimension_semantics<parallel>], iteration_bounds = array<i64: 1>, scalar_prefetch = 0 : i64, scratch_operands = 0 : i64, tpu.core_type = #tpu.core_type<tc>, window_params = [{transform_indices = @transform_0, window_bounds = array<i64: 8, 128>}, {pipeline_mode = #tpu.pipeline_mode<synchronous>, transform_indices = @transform_1, window_bounds = array<i64: 2, 128>}, {pipeline_mode = #tpu.pipeline_mode<synchronous>, transform_indices = @transform_2, window_bounds = array<i64: 128, 128>}, {pipeline_mode = #tpu.pipeline_mode<synchronous>, transform_indices = @transform_3, window_bounds = array<i64: 3, 128>}, {pipeline_mode = #tpu.pipeline_mode<synchronous>, transform_indices = @transform_4, window_bounds = array<i64: 128, 128>}, {pipeline_mode = #tpu.pipeline_mode<synchronous>, transform_indices = @transform_5, window_bounds = array<i64: 1, 128>}, {pipeline_mode = #tpu.pipeline_mode<synchronous>, transform_indices = @transform_6, window_bounds = array<i64: 128, 16>}, {pipeline_mode = #tpu.pipeline_mode<synchronous>, transform_indices = @transform_7, window_bounds = array<i64: 1, 16>}, {transform_indices = @transform_8, window_bounds = array<i64: 8, 16>}]} {
    %c0 = arith.constant 0 : index
    %c0_0 = arith.constant 0 : index
    %0 = vector.load %arg1[%c0, %c0_0] : memref<8x128xf32, #tpu.memory_space<vmem>>, vector<8x128xf32>
    %c0_1 = arith.constant 0 : index
    %c0_2 = arith.constant 0 : index
    %1 = vector.load %arg2[%c0_1, %c0_2] : memref<2x128xf32, #tpu.memory_space<vmem>>, vector<1x128xf32>
    %c1 = arith.constant 1 : index
    %c0_3 = arith.constant 0 : index
    %2 = vector.load %arg2[%c1, %c0_3] : memref<2x128xf32, #tpu.memory_space<vmem>>, vector<1x128xf32>
    %cst = arith.constant dense<0.000000e+00> : vector<8xf32>
    %3 = vector.multi_reduction <add>, %0, %cst [1] : vector<8x128xf32> to vector<8xf32>
    %4 = vector.shape_cast %3 : vector<8xf32> to vector<8x1xf32>
    %5 = arith.mulf %0, %0 : vector<8x128xf32>
    %cst_4 = arith.constant dense<0.000000e+00> : vector<8xf32>
    %6 = vector.multi_reduction <add>, %5, %cst_4 [1] : vector<8x128xf32> to vector<8xf32>
    %7 = vector.shape_cast %6 : vector<8xf32> to vector<8x1xf32>
    %cst_5 = arith.constant 3.125000e-02 : f32
    %8 = vector.broadcast %cst_5 : f32 to vector<8x1xf32>
    %9 = arith.mulf %4, %8 : vector<8x1xf32>
    %cst_6 = arith.constant 3.125000e-02 : f32
    %10 = vector.broadcast %cst_6 : f32 to vector<8x1xf32>
    %11 = arith.mulf %7, %10 : vector<8x1xf32>
    %12 = arith.mulf %9, %9 : vector<8x1xf32>
    %13 = arith.subf %11, %12 : vector<8x1xf32>
    %cst_7 = arith.constant 0.000000e+00 : f32
    %14 = vector.broadcast %cst_7 : f32 to vector<8x1xf32>
    %15 = arith.maximumf %13, %14 : vector<8x1xf32>
    %16 = vector.broadcast %9 : vector<8x1xf32> to vector<8x128xf32>
    %17 = arith.subf %0, %16 : vector<8x128xf32>
    %cst_8 = arith.constant 9.99999974E-6 : f32
    %18 = vector.broadcast %cst_8 : f32 to vector<8x1xf32>
    %19 = arith.addf %15, %18 : vector<8x1xf32>
    %20 = math.rsqrt %19 : vector<8x1xf32>
    %21 = vector.broadcast %20 : vector<8x1xf32> to vector<8x128xf32>
    %22 = arith.mulf %17, %21 : vector<8x128xf32>
    %23 = vector.broadcast %1 : vector<1x128xf32> to vector<8x128xf32>
    %24 = arith.mulf %22, %23 : vector<8x128xf32>
    %25 = vector.broadcast %2 : vector<1x128xf32> to vector<8x128xf32>
    %26 = arith.addf %24, %25 : vector<8x128xf32>
    %c0_9 = arith.constant 0 : index
    %c0_10 = arith.constant 0 : index
    %27 = vector.load %arg3[%c0_9, %c0_10] : memref<128x128xf32, #tpu.memory_space<vmem>>, vector<128x128xf32>
    %cst_11 = arith.constant dense<0.000000e+00> : vector<8x128xf32>
    %28 = tpu.matmul %26, %27, %cst_11 {dimension_numbers = #tpu.dot_dimension_numbers<[1], [0], [0], [1], [0, 0, 1, 1], [], []>} : vector<8x128xf32>, vector<128x128xf32>, vector<8x128xf32> -> vector<8x128xf32>
    %c2 = arith.constant 2 : index
    %c0_12 = arith.constant 0 : index
    %29 = vector.load %arg4[%c2, %c0_12] : memref<3x128xf32, #tpu.memory_space<vmem>>, vector<1x128xf32>
    %30 = vector.broadcast %29 : vector<1x128xf32> to vector<8x128xf32>
    %31 = arith.addf %28, %30 : vector<8x128xf32>
    %cst_13 = arith.constant 0.000000e+00 : f32
    %32 = vector.broadcast %cst_13 : f32 to vector<8x128xf32>
    %33 = arith.maximumf %31, %32 : vector<8x128xf32>
    %c0_14 = arith.constant 0 : index
    %c0_15 = arith.constant 0 : index
    %34 = vector.load %arg4[%c0_14, %c0_15] : memref<3x128xf32, #tpu.memory_space<vmem>>, vector<1x128xf32>
    %c1_16 = arith.constant 1 : index
    %c0_17 = arith.constant 0 : index
    %35 = vector.load %arg4[%c1_16, %c0_17] : memref<3x128xf32, #tpu.memory_space<vmem>>, vector<1x128xf32>
    %cst_18 = arith.constant dense<0.000000e+00> : vector<8xf32>
    %36 = vector.multi_reduction <add>, %33, %cst_18 [1] : vector<8x128xf32> to vector<8xf32>
    %37 = vector.shape_cast %36 : vector<8xf32> to vector<8x1xf32>
    %38 = arith.mulf %33, %33 : vector<8x128xf32>
    %cst_19 = arith.constant dense<0.000000e+00> : vector<8xf32>
    %39 = vector.multi_reduction <add>, %38, %cst_19 [1] : vector<8x128xf32> to vector<8xf32>
    %40 = vector.shape_cast %39 : vector<8xf32> to vector<8x1xf32>
    %cst_20 = arith.constant 1.562500e-02 : f32
    %41 = vector.broadcast %cst_20 : f32 to vector<8x1xf32>
    %42 = arith.mulf %37, %41 : vector<8x1xf32>
    %cst_21 = arith.constant 1.562500e-02 : f32
    %43 = vector.broadcast %cst_21 : f32 to vector<8x1xf32>
    %44 = arith.mulf %40, %43 : vector<8x1xf32>
    %45 = arith.mulf %42, %42 : vector<8x1xf32>
    %46 = arith.subf %44, %45 : vector<8x1xf32>
    %cst_22 = arith.constant 0.000000e+00 : f32
    %47 = vector.broadcast %cst_22 : f32 to vector<8x1xf32>
    %48 = arith.maximumf %46, %47 : vector<8x1xf32>
    %49 = vector.broadcast %42 : vector<8x1xf32> to vector<8x128xf32>
    %50 = arith.subf %33, %49 : vector<8x128xf32>
    %cst_23 = arith.constant 9.99999974E-6 : f32
    %51 = vector.broadcast %cst_23 : f32 to vector<8x1xf32>
    %52 = arith.addf %48, %51 : vector<8x1xf32>
    %53 = math.rsqrt %52 : vector<8x1xf32>
    %54 = vector.broadcast %53 : vector<8x1xf32> to vector<8x128xf32>
    %55 = arith.mulf %50, %54 : vector<8x128xf32>
    %56 = vector.broadcast %34 : vector<1x128xf32> to vector<8x128xf32>
    %57 = arith.mulf %55, %56 : vector<8x128xf32>
    %58 = vector.broadcast %35 : vector<1x128xf32> to vector<8x128xf32>
    %59 = arith.addf %57, %58 : vector<8x128xf32>
    %c0_24 = arith.constant 0 : index
    %c0_25 = arith.constant 0 : index
    %60 = vector.load %arg5[%c0_24, %c0_25] : memref<128x128xf32, #tpu.memory_space<vmem>>, vector<128x128xf32>
    %cst_26 = arith.constant dense<0.000000e+00> : vector<8x128xf32>
    %61 = tpu.matmul %59, %60, %cst_26 {dimension_numbers = #tpu.dot_dimension_numbers<[1], [0], [0], [1], [0, 0, 1, 1], [], []>} : vector<8x128xf32>, vector<128x128xf32>, vector<8x128xf32> -> vector<8x128xf32>
    %c0_27 = arith.constant 0 : index
    %c0_28 = arith.constant 0 : index
    %62 = vector.load %arg6[%c0_27, %c0_28] : memref<1x128xf32, #tpu.memory_space<vmem>>, vector<1x128xf32>
    %63 = vector.broadcast %62 : vector<1x128xf32> to vector<8x128xf32>
    %64 = arith.addf %61, %63 : vector<8x128xf32>
    %cst_29 = arith.constant 0.000000e+00 : f32
    %65 = vector.broadcast %cst_29 : f32 to vector<8x128xf32>
    %66 = arith.maximumf %64, %65 : vector<8x128xf32>
    %c0_30 = arith.constant 0 : index
    %c0_31 = arith.constant 0 : index
    %67 = vector.load %arg7[%c0_30, %c0_31] : memref<128x16xf32, #tpu.memory_space<vmem>>, vector<128x16xf32>
    %cst_32 = arith.constant dense<0.000000e+00> : vector<8x16xf32>
    %68 = tpu.matmul %66, %67, %cst_32 {dimension_numbers = #tpu.dot_dimension_numbers<[1], [0], [0], [1], [0, 0, 1, 1], [], []>} : vector<8x128xf32>, vector<128x16xf32>, vector<8x16xf32> -> vector<8x16xf32>
    %c0_33 = arith.constant 0 : index
    %c0_34 = arith.constant 0 : index
    %69 = vector.load %arg8[%c0_33, %c0_34] : memref<1x16xf32, #tpu.memory_space<vmem>>, vector<1x16xf32>
    %70 = vector.broadcast %69 : vector<1x16xf32> to vector<8x16xf32>
    %71 = arith.addf %68, %70 : vector<8x16xf32>
    %c0_35 = arith.constant 0 : index
    %c0_36 = arith.constant 0 : index
    %72 = vector.load %arg9[%c0_35, %c0_36] : memref<8x16xf32, #tpu.memory_space<vmem>>, vector<8x16xf32>
    tpu.vector_store %arg9[%c0_35, %c0_36], %71 {strides = array<i32>} : memref<8x16xf32, #tpu.memory_space<vmem>>, vector<8x16xf32>,
    return
  }
  func.func @transform_0(%arg0: i32) -> (i32, i32) {
    %c0_i32 = arith.constant 0 : i32
    %c0_i32_0 = arith.constant 0 : i32
    return %arg0, %c0_i32 : i32, i32
  }
  func.func @transform_1(%arg0: i32) -> (i32, i32) {
    %c0_i32 = arith.constant 0 : i32
    %c0_i32_0 = arith.constant 0 : i32
    %c0_i32_1 = arith.constant 0 : i32
    return %c0_i32, %c0_i32_0 : i32, i32
  }
  func.func @transform_2(%arg0: i32) -> (i32, i32) {
    %c0_i32 = arith.constant 0 : i32
    %c0_i32_0 = arith.constant 0 : i32
    %c0_i32_1 = arith.constant 0 : i32
    return %c0_i32, %c0_i32_0 : i32, i32
  }
  func.func @transform_3(%arg0: i32) -> (i32, i32) {
    %c0_i32 = arith.constant 0 : i32
    %c0_i32_0 = arith.constant 0 : i32
    %c0_i32_1 = arith.constant 0 : i32
    return %c0_i32, %c0_i32_0 : i32, i32
  }
  func.func @transform_4(%arg0: i32) -> (i32, i32) {
    %c0_i32 = arith.constant 0 : i32
    %c0_i32_0 = arith.constant 0 : i32
    %c0_i32_1 = arith.constant 0 : i32
    return %c0_i32, %c0_i32_0 : i32, i32
  }
  func.func @transform_5(%arg0: i32) -> (i32, i32) {
    %c0_i32 = arith.constant 0 : i32
    %c0_i32_0 = arith.constant 0 : i32
    %c0_i32_1 = arith.constant 0 : i32
    return %c0_i32, %c0_i32_0 : i32, i32
  }
  func.func @transform_6(%arg0: i32) -> (i32, i32) {
    %c0_i32 = arith.constant 0 : i32
    %c0_i32_0 = arith.constant 0 : i32
    %c0_i32_1 = arith.constant 0 : i32
    return %c0_i32, %c0_i32_0 : i32, i32
  }
  func.func @transform_7(%arg0: i32) -> (i32, i32) {
    %c0_i32 = arith.constant 0 : i32
    %c0_i32_0 = arith.constant 0 : i32
    %c0_i32_1 = arith.constant 0 : i32
    return %c0_i32, %c0_i32_0 : i32, i32
  }
  func.func @transform_8(%arg0: i32) -> (i32, i32) {
    %c0_i32 = arith.constant 0 : i32
    %c0_i32_0 = arith.constant 0 : i32
    return %arg0, %c0_i32 : i32, i32
  }
}

</mosaic_0001>

<bundles_post_ra>
// kernel: tpu_custom_call.1
= control target key start
LH: loop header
LB: loop body
LE: loop exit
PB: predicated region body
PF: predicated region fallthrough
CT: control target
= control target key end

     0   :  { %13 = vsyncpa [#allocation3], 0  ;;  %s916_s0 = inlined_call_operand.vmem [shape: f32[8,128], index: 0, kind: input, shape index: {}]   ;;  %s917_s1 = inlined_call_operand.vmem [shape: f32[2,128], index: 1, kind: input, shape index: {}]   ;;  %s918_s2 = inlined_call_operand.vmem [shape: f32[128,128], index: 2, kind: input, shape index: {}]   ;;  %s919_s3 = inlined_call_operand.vmem [shape: f32[3,128], index: 3, kind: input, shape index: {}]   ;;  %s920_s4 = inlined_call_operand.hbm [shape: f32[128,128], index: 4, kind: input, shape index: {}]   ;;  %s921_s5 = inlined_call_operand.vmem [shape: f32[1,128], index: 5, kind: input, shape index: {}]   ;;  %s922_s6 = inlined_call_operand.vmem [shape: f32[128,16], index: 6, kind: input, shape index: {}]   ;;  %s923_s7 = inlined_call_operand.vmem [shape: f32[1,16], index: 7, kind: input, shape index: {}]   ;;  %s924_s8 = inlined_call_operand.hbm [shape: f32[8,16], index: 8, kind: output, shape index: {}]  }
   0x1   :  { %14 = vsyncpa [#allocation4], 0  ;;  %s687_s27 = smov [#allocation2]   ;;  %s639_s9 = scalar_lea.hbm %s920_s4, 2048 }
   0x2   :  { %s28_s28 = sshll.u32 %s687_s27, 4  ;;  %p640_p0 = scmp.ne.s32.totalorder %s920_s4, %s639_s9  ;;  %s29_s28 = int_to_ptr.vmem [resolvable:$true] %s28_s28 }
   0x3   :  { %p643_p1 = scmp.lt.u32.totalorder %s639_s9, %s920_s4 }
   0x5   :  { %p645_p2 = pnand %p643_p1, %p640_p0 }
   0x7   :  { %648 = shalt.err (!%p645_p2)
}
   0x8   :  { %s649_s14 = scalar_lea.vmem %s29_s28, 2048  ;;  %p654_p4 = scmp.lt.s32.totalorder %s29_s28, %s29_s28 }
   0x9   :  { %p650_p3 = scmp.ne.s32.totalorder %s29_s28, %s649_s14  ;;  %p655_p5 = scmp.lt.s32.totalorder %s649_s14, %s649_s14 }
   0xb   :  { %p656_p6 = por %p655_p5, %p654_p4 }
   0xd   :  { %p657_p7 = pnand %p656_p6, %p650_p3 }
   0xf   :  { %660 = shalt.err (!%p657_p7)
}
  0x10   :  { %s688_s15 = smov 128   ;;  %s689_s16 = smov 8  }
  0x11   :  { %34 = dma.hbm_to_vmem [thread:$0]  %s920_s4, 2048, %s29_s28, [#allocation3], %s688_s15, %s688_s15, %s689_s16  }
  0x12   :  { %683 = dma.done.wait [#allocation3], 2048  }
  0x13   :  { %684 = vsyncadd [#allocation3], 4294965248  ;;  %v690_v0 = vmov 0.0|0.0   ;;  %v44_v1 = vld [vmem:[%s916_s0] sm:$0xff]  ;;  %v72_v3 = vld [vmem:[%s918_s2 + $0x8] sm:$0xff]  ;;  %vm691_vm0 = vmmov 0  }
  0x14   :  { %556 = vmatprep.subr.bf16.mxu0 %v690_v0  ;;  %580 = vmatprep.subr.bf16.mxu1 %v690_v0  ;;  %v71_v2 = vld [vmem:[%s918_s2] sm:$0xff]  ;;  %v49_v4 = vmul.f32 %v44_v1, %v44_v1  ;;  %v73_v6 = vld [vmem:[%s918_s2 + $0x10] sm:$0xff]  ;;  %v74_v7 = vld [vmem:[%s918_s2 + $0x18] sm:$0xff]  ;;  %v692_v20 = vmov 0.0   ;;  %s693_s22 = smov [#allocation5]   ;;  %vm376_vm1 = vcmask 130048  }
  0x15   :  { %47 = vadd.xlane.f32.xlu0 %v44_v1  ;;  %v557_v5 = vpack.c.bf16 %v72_v3, %v71_v2  ;;  %v560_v8 = vpack.c.bf16 %v74_v7, %v73_v6  ;;  %v75_v9 = vld [vmem:[%s918_s2 + $0x20] sm:$0xff]  ;;  %v76_v10 = vld [vmem:[%s918_s2 + $0x28] sm:$0xff]  ;;  %v77_v12 = vld [vmem:[%s918_s2 + $0x30] sm:$0xff]  ;;  %483 = vmatprep.mubr.msk.f32.mxu0 %vm691_vm0, %v692_v20  ;;  %s384_s23 = sshll.u32 %s693_s22, 4  ;;  %s385_s23 = int_to_ptr.vmem [resolvable:$true] %s384_s23 }
  0x16   :  { %v563_v11 = vpack.c.bf16 %v76_v10, %v75_v9  ;;  %v78_v13 = vld [vmem:[%s918_s2 + $0x38] sm:$0xff]  ;;  %v79_v15 = vld [vmem:[%s918_s2 + $0x40] sm:$0xff]  ;;  %v80_v16 = vld [vmem:[%s918_s2 + $0x48] sm:$0xff]  ;;  %518 = vmatprep.mubr.msk.f32.mxu1 %vm691_vm0, %v692_v20  ;;  %p666_p9 = scmp.lt.s32.totalorder %s385_s23, %s385_s23 }
  0x17   :  { %558 = vmatpush3.bf16.msra.mxu0 %v557_v5  ;;  %v566_v14 = vpack.c.bf16 %v78_v13, %v77_v12  ;;  %v569_v17 = vpack.c.bf16 %v80_v16, %v79_v15  ;;  %v81_v18 = vld [vmem:[%s918_s2 + $0x50] sm:$0xff]  ;;  %v82_v19 = vld [vmem:[%s918_s2 + $0x58] sm:$0xff]  ;;  %v83_v22 = vld [vmem:[%s918_s2 + $0x60] sm:$0xff] }
  0x18   :  { %559 = vmatprep.subr.bf16.mxu0 %v690_v0  ;;  %v572_v21 = vpack.c.bf16 %v82_v19, %v81_v18  ;;  %v84_v23 = vld [vmem:[%s918_s2 + $0x68] sm:$0xff]  ;;  %v85_v25 = vld [vmem:[%s918_s2 + $0x70] sm:$0xff]  ;;  %v86_v26 = vld [vmem:[%s918_s2 + $0x78] sm:$0xff] }
  0x19   :  { %50 = vadd.xlane.f32.xlu0 %v49_v4  ;;  %v575_v24 = vpack.c.bf16 %v84_v23, %v83_v22  ;;  %v578_v27 = vpack.c.bf16 %v86_v26, %v85_v25  ;;  %v393_v38 = vld [vmem:[%s917_s1] ss:$0 sm:$0xff]  ;;  %v394_v40 = vld [vmem:[%s917_s1 + $0x1] ss:$0 sm:$0xff]  ;;  %v190_v44 = vld [vmem:[#allocation2 + $0x8] sm:$0xff] }
  0x1a   :  { %v189_v43 = vld [vmem:[#allocation2] sm:$0xff]  ;;  %v191_v52 = vld [vmem:[#allocation2 + $0x10] sm:$0xff]  ;;  %v192_v53 = vld [vmem:[#allocation2 + $0x18] sm:$0xff] }
  0x1b   :  { %561 = vmatpush3.bf16.msra.mxu0 %v560_v8  ;;  %v581_v45 = vpack.c.bf16 %v190_v44, %v189_v43  ;;  %v395_v46 = vld [vmem:[%s919_s3 + $0x2] ss:$0 sm:$0xff]  ;;  %v584_v54 = vpack.c.bf16 %v192_v53, %v191_v52  ;;  %v194_v56 = vld [vmem:[#allocation2 + $0x28] sm:$0xff]  ;;  %v195_v58 = vld [vmem:[#allocation2 + $0x30] sm:$0xff] }
  0x1c   :  { %562 = vmatprep.subr.bf16.mxu0 %v690_v0  ;;  %v193_v55 = vld [vmem:[#allocation2 + $0x20] sm:$0xff]  ;;  %v196_v59 = vld [vmem:[#allocation2 + $0x38] sm:$0xff]  ;;  %v198_v62 = vld [vmem:[#allocation2 + $0x48] sm:$0xff] }
  0x1d   :  { %582 = vmatpush3.bf16.msra.mxu1 %v581_v45  ;;  %v587_v57 = vpack.c.bf16 %v194_v56, %v193_v55  ;;  %v590_v60 = vpack.c.bf16 %v196_v59, %v195_v58  ;;  %v197_v61 = vld [vmem:[#allocation2 + $0x40] sm:$0xff]  ;;  %v200_v2 = vld [vmem:[#allocation2 + $0x58] sm:$0xff]  ;;  %v202_v5 = vld [vmem:[#allocation2 + $0x68] sm:$0xff] }
  0x1e   :  { %583 = vmatprep.subr.bf16.mxu1 %v690_v0  ;;  %v593_v63 = vpack.c.bf16 %v198_v62, %v197_v61  ;;  %v201_v4 = vld [vmem:[#allocation2 + $0x60] sm:$0xff]  ;;  %v203_v7 = vld [vmem:[#allocation2 + $0x70] sm:$0xff]  ;;  %v204_v8 = vld [vmem:[#allocation2 + $0x78] sm:$0xff] }
  0x1f   :  { %564 = vmatpush3.bf16.msra.mxu0 %v563_v11  ;;  %v599_v6 = vpack.c.bf16 %v202_v5, %v201_v4  ;;  %v602_v9 = vpack.c.bf16 %v204_v8, %v203_v7  ;;  %v283_v10 = vld [vmem:[%s922_s6] sm:$0xff]  ;;  %v284_v11 = vld [vmem:[%s922_s6 + $0x8] sm:$0xff]  ;;  %v285_v12 = vld [vmem:[%s922_s6 + $0x10] sm:$0xff] }
  0x20   :  { %565 = vmatprep.subr.bf16.mxu0 %v690_v0  ;;  %v605_v13 = vpack.c.bf16 %v284_v11, %v283_v10  ;;  %v287_v16 = vld [vmem:[%s922_s6 + $0x20] sm:$0xff]  ;;  %v289_v19 = vld [vmem:[%s922_s6 + $0x30] sm:$0xff]  ;;  %v292_v23 = vld [vmem:[%s922_s6 + $0x48] sm:$0xff] }
  0x21   :  { %585 = vmatpush3.bf16.msra.mxu1 %v584_v54  ;;  %v291_v22 = vld [vmem:[%s922_s6 + $0x40] sm:$0xff]  ;;  %v293_v25 = vld [vmem:[%s922_s6 + $0x50] sm:$0xff]  ;;  %v294_v26 = vld [vmem:[%s922_s6 + $0x58] sm:$0xff] }
  0x22   :  { %586 = vmatprep.subr.bf16.mxu1 %v690_v0  ;;  %v297_v45 = vld [vmem:[%s922_s6 + $0x70] sm:$0xff]  ;;  %v399_v53 = vld [vmem:[%s923_s7] ss:$0 sm:$0xff] }
  0x23   :  { %567 = vmatpush3.bf16.msra.mxu0 %v566_v14  ;;  %v286_v14 = vld [vmem:[%s922_s6 + $0x18] sm:$0xff] }
  0x24   :  { %568 = vmatprep.subr.bf16.mxu0 %v690_v0  ;;  %v608_v15 = vpack.c.bf16 %v286_v14, %v285_v12 }
  0x25   :  { %588 = vmatpush3.bf16.msra.mxu1 %v587_v57 }
  0x26   :  { %589 = vmatprep.subr.bf16.mxu1 %v690_v0 }
  0x27   :  { %570 = vmatpush3.bf16.msra.mxu0 %v569_v17  ;;  %v288_v17 = vld [vmem:[%s922_s6 + $0x28] sm:$0xff] }
  0x28   :  { %571 = vmatprep.subr.bf16.mxu0 %v690_v0  ;;  %v611_v18 = vpack.c.bf16 %v288_v17, %v287_v16 }
  0x29   :  { %591 = vmatpush3.bf16.msra.mxu1 %v590_v60 }
  0x2a   :  { %592 = vmatprep.subr.bf16.mxu1 %v690_v0 }
  0x2b   :  { %573 = vmatpush3.bf16.msra.mxu0 %v572_v21 }
  0x2c   :  { %574 = vmatprep.subr.bf16.mxu0 %v690_v0 }
  0x2d   :  { %594 = vmatpush3.bf16.msra.mxu1 %v593_v63 }
  0x2e   :  { %595 = vmatprep.subr.bf16.mxu1 %v690_v0 }
  0x2f   :  { %576 = vmatpush3.bf16.msra.mxu0 %v575_v24  ;;  %v617_v24 = vpack.c.bf16 %v292_v23, %v291_v22 }
  0x30   :  { %577 = vmatprep.subr.bf16.mxu0 %v690_v0 }
  0x33   :  { %579 = vmatpush3.bf16.msra.mxu0 %v578_v27  ;;  %v620_v27 = vpack.c.bf16 %v294_v26, %v293_v25 }
  0x34   :  { %604 = vmatprep.subr.bf16.mxu0 %v690_v0 }
  0xa2   :  { %v48_v28 = vpop.xlane.xlu0 %47 }
  0xa3   :  { %v52_v29 = vmul.f32 0.03125, %v48_v28  ;;  %v295_v28 = vld [vmem:[%s922_s6 + $0x60] sm:$0xff] }
  0xa5   :  { %v54_v31 = vmul.f32 %v52_v29, %v52_v29  ;;  %v57_v36 = vsub.f32 %v44_v1, %v52_v29  ;;  %v199_v1 = vld [vmem:[#allocation2 + $0x50] sm:$0xff]  ;;  %v296_v29 = vld [vmem:[%s922_s6 + $0x68] sm:$0xff] }
  0xa6   :  { %v51_v30 = vpop.xlane.xlu0 %50  ;;  %v596_v3 = vpack.c.bf16 %v200_v2, %v199_v1 }
  0xa7   :  { %v53_v32 = vmul.f32 0.03125, %v51_v30  ;;  %v623_v30 = vpack.c.bf16 %v296_v29, %v295_v28 }
  0xa8   :  { %597 = vmatpush3.bf16.msra.mxu1 %v596_v3 }
  0xa9   :  { %v55_v33 = vsub.f32 %v53_v32, %v54_v31  ;;  %598 = vmatprep.subr.bf16.mxu1 %v690_v0 }
  0xab   :  { %v56_v34 = vmax.f32 %v55_v33, 0.0 }
  0xac   :  { %600 = vmatpush3.bf16.msra.mxu1 %v599_v6 }
  0xad   :  { %v58_v35 = vadd.f32 1e-05, %v56_v34  ;;  %601 = vmatprep.subr.bf16.mxu1 %v690_v0 }
  0xaf   :  { %635 = vrsqrt.f32 %v58_v35 }
  0xb0   :  { %603 = vmatpush3.bf16.msra.mxu1 %v602_v9 }
  0xb9   :  { %v636_v37 = vpop.eup %635 }
  0xba   :  { %v60_v39 = vmul.f32 %v636_v37, %v57_v36 }
  0xbc   :  { %v65_v41 = vmul.f32 %v393_v38, %v60_v39 }
  0xbe   :  { %v70_v42 = vadd.f32 %v394_v40, %v65_v41  ;;  %v396_v41 = vld [vmem:[%s919_s3] ss:$0 sm:$0xff] }
  0xc0   :  { %484 = vmatmul.mubr.f32.vlgmr.msra.gmra.mrb[0].mxu0 %v70_v42 }
  0xc1   :  { %553 = vmatprep.mubr.msk.f32.mxu0 %vm691_vm0, %v692_v20  ;;  %606 = vmatpush3.bf16.msra.mxu0 %v605_v13  ;;  %v290_v20 = vld [vmem:[%s922_s6 + $0x38] sm:$0xff] }
  0xc2   :  { %607 = vmatprep.subr.bf16.mxu0 %v690_v0  ;;  %v614_v21 = vpack.c.bf16 %v290_v20, %v289_v19 }
  0xc5   :  { %609 = vmatpush3.bf16.msra.mxu0 %v608_v15 }
  0xc6   :  { %610 = vmatprep.subr.bf16.mxu0 %v690_v0 }
  0xc9   :  { %612 = vmatpush3.bf16.msra.mxu0 %v611_v18 }
  0xca   :  { %613 = vmatprep.subr.bf16.mxu0 %v690_v0 }
  0xcd   :  { %615 = vmatpush3.bf16.msra.mxu0 %v614_v21 }
  0xce   :  { %616 = vmatprep.subr.bf16.mxu0 %v690_v0 }
  0xd1   :  { %618 = vmatpush3.bf16.msra.mxu0 %v617_v24 }
  0xd2   :  { %619 = vmatprep.subr.bf16.mxu0 %v690_v0 }
  0xd5   :  { %621 = vmatpush3.bf16.msra.mxu0 %v620_v27 }
  0xd6   :  { %622 = vmatprep.subr.bf16.mxu0 %v690_v0 }
  0xd9   :  { %624 = vmatpush3.bf16.msra.mxu0 %v623_v30 }
  0xda   :  { %625 = vmatprep.subr.bf16.mxu0 %v690_v0  ;;  %v397_v0 = vld [vmem:[%s919_s3 + $0x1] ss:$0 sm:$0xff] }
 0x193   :  { %v158_v47 = vpop.f32.mrb[0].mxu0 }
 0x194   :  { %v159_v48 = vadd.f32 %v395_v46, %v158_v47  ;;  %v485_v49 = vpop.f32.mrb[1].mxu0  ;;  %v298_v46 = vld [vmem:[%s922_s6 + $0x78] sm:$0xff]  ;;  %s661_s6 = scalar_lea.vmem %s385_s23, 128 }
 0x195   :  { %v626_v47 = vpack.c.bf16 %v298_v46, %v297_v45  ;;  %p662_p8 = scmp.ne.s32.totalorder %s385_s23, %s661_s6  ;;  %p667_p10 = scmp.lt.s32.totalorder %s661_s6, %s661_s6 }
 0x196   :  { %v825_v50 = vmax.f32 %v159_v48, 0.0  ;;  %v398_v48 = vld [vmem:[%s921_s5] ss:$0 sm:$0xff] }
 0x197   :  { %627 = vmatpush3.bf16.msra.mxu0 %v626_v47  ;;  %p668_p11 = por %p667_p10, %p666_p9 }
 0x198   :  { %165 = vadd.xlane.f32.xlu1 %v825_v50  ;;  %v167_v51 = vmul.f32 %v825_v50, %v825_v50 }
 0x199   :  { %p669_p12 = pnand %p668_p11, %p662_p8 }
 0x19c   :  { %168 = vadd.xlane.f32.xlu1 %v167_v51 }
 0x225   :  { %v166_v31 = vpop.xlane.xlu1 %165 }
 0x226   :  { %v170_v32 = vmul.f32 0.015625, %v166_v31 }
 0x228   :  { %v172_v34 = vmul.f32 %v170_v32, %v170_v32  ;;  %v175_v39 = vsub.f32 %v825_v50, %v170_v32 }
 0x229   :  { %v169_v33 = vpop.xlane.xlu1 %168 }
 0x22a   :  { %v171_v35 = vmul.f32 0.015625, %v169_v33 }
 0x22c   :  { %v173_v36 = vsub.f32 %v171_v35, %v172_v34 }
 0x22e   :  { %v174_v37 = vmax.f32 %v173_v36, 0.0 }
 0x230   :  { %v176_v38 = vadd.f32 1e-05, %v174_v37 }
 0x232   :  { %637 = vrsqrt.f32 %v176_v38 }
 0x23c   :  { %v638_v40 = vpop.eup %637 }
 0x23d   :  { %v178_v42 = vmul.f32 %v638_v40, %v175_v39 }
 0x23f   :  { %v183_v43 = vmul.f32 %v396_v41, %v178_v42 }
 0x241   :  { %v188_v44 = vadd.f32 %v397_v0, %v183_v43 }
 0x243   :  { %519 = vmatmul.mubr.f32.vlgmr.msra.gmra.mrb[0].mxu1 %v188_v44 }
 0x316   :  { %v278_v49 = vpop.f32.mrb[0].mxu1 }
 0x317   :  { %v279_v50 = vadd.f32 %v398_v48, %v278_v49  ;;  %v520_v51 = vpop.f32.mrb[1].mxu1 }
 0x319   :  { %v282_v52 = vmax.f32 %v279_v50, 0.0 }
 0x31b   :  { %554 = vmatmul.mubr.f32.vlgmr.msra.gmra.mrb[2].mxu0 %v282_v52 }
 0x3ee   :  { %v372_v54 = vpop.f32.mrb[2].mxu0 }
 0x3ef   :  { %v373_v55 = vadd.f32 %v399_v53, %v372_v54  ;;  %v555_v56 = vpop.f32.mrb[3].mxu0 }
 0x3f1   :  { %377 = vst.msk [vmem:[#allocation5] sm:$0xff] %vm376_vm1, %v373_v55 }
 0x3f2   :  { %672 = shalt.err (!%p669_p12)
}
 0x3f3   :  { %s673_s4 = scalar_lea.hbm %s924_s8, 128 }
 0x3f4   :  { %p674_p13 = scmp.ne.s32.totalorder %s924_s8, %s673_s4  ;;  %p677_p0 = scmp.lt.u32.totalorder %s673_s4, %s924_s8 }
 0x3f6   :  { %p679_p1 = pnand %p677_p0, %p674_p13 }
 0x3f8   :  { %682 = shalt.err (!%p679_p1)
}
 0x3f9   :  { %387 = dma.vmem_to_hbm [thread:$0]  %s385_s23, 128, %s924_s8, [#allocation4]  }
 0x3fa   :  { %685 = dma.done.wait [#allocation4], 128  }
 0x3fb   :  { %686 = vsyncadd [#allocation4], 4294967168 }
 0x3fc   :  { %391 = vsyncpa [#allocation3], 1 }
 0x3fd   :  { %392 = vsyncpa [#allocation4], 1 }

// kernel: tpu_custom_call.1
= control target key start
LH: loop header
LB: loop body
LE: loop exit
PB: predicated region body
PF: predicated region fallthrough
CT: control target
= control target key end

     0   :  { %13 = vsyncpa [#allocation3], 0  ;;  %s916_s0 = inlined_call_operand.vmem [shape: f32[8,128], index: 0, kind: input, shape index: {}]   ;;  %s917_s1 = inlined_call_operand.vmem [shape: f32[2,128], index: 1, kind: input, shape index: {}]   ;;  %s918_s2 = inlined_call_operand.vmem [shape: f32[128,128], index: 2, kind: input, shape index: {}]   ;;  %s919_s3 = inlined_call_operand.vmem [shape: f32[3,128], index: 3, kind: input, shape index: {}]   ;;  %s920_s4 = inlined_call_operand.hbm [shape: f32[128,128], index: 4, kind: input, shape index: {}]   ;;  %s921_s5 = inlined_call_operand.vmem [shape: f32[1,128], index: 5, kind: input, shape index: {}]   ;;  %s922_s6 = inlined_call_operand.vmem [shape: f32[128,16], index: 6, kind: input, shape index: {}]   ;;  %s923_s7 = inlined_call_operand.vmem [shape: f32[1,16], index: 7, kind: input, shape index: {}]   ;;  %s924_s8 = inlined_call_operand.hbm [shape: f32[8,16], index: 8, kind: output, shape index: {}]  }
   0x1   :  { %14 = vsyncpa [#allocation4], 0  ;;  %s687_s27 = smov [#allocation2]   ;;  %s639_s9 = scalar_lea.hbm %s920_s4, 2048 }
   0x2   :  { %s28_s28 = sshll.u32 %s687_s27, 4  ;;  %p640_p0 = scmp.ne.s32.totalorder %s920_s4, %s639_s9  ;;  %s29_s28 = int_to_ptr.vmem [resolvable:$true] %s28_s28 }
   0x3   :  { %p643_p1 = scmp.lt.u32.totalorder %s639_s9, %s920_s4 }
   0x5   :  { %p645_p2 = pnand %p643_p1, %p640_p0 }
   0x7   :  { %648 = shalt.err (!%p645_p2)
}
   0x8   :  { %s649_s14 = scalar_lea.vmem %s29_s28, 2048  ;;  %p654_p4 = scmp.lt.s32.totalorder %s29_s28, %s29_s28 }
   0x9   :  { %p650_p3 = scmp.ne.s32.totalorder %s29_s28, %s649_s14  ;;  %p655_p5 = scmp.lt.s32.totalorder %s649_s14, %s649_s14 }
   0xb   :  { %p656_p6 = por %p655_p5, %p654_p4 }
   0xd   :  { %p657_p7 = pnand %p656_p6, %p650_p3 }
   0xf   :  { %660 = shalt.err (!%p657_p7)
}
  0x10   :  { %s688_s15 = smov 128   ;;  %s689_s16 = smov 8  }
  0x11   :  { %34 = dma.hbm_to_vmem [thread:$0]  %s920_s4, 2048, %s29_s28, [#allocation3], %s688_s15, %s688_s15, %s689_s16  }
  0x12   :  { %683 = dma.done.wait [#allocation3], 2048  }
  0x13   :  { %684 = vsyncadd [#allocation3], 4294965248  ;;  %v690_v0 = vmov 0.0|0.0   ;;  %v44_v1 = vld [vmem:[%s916_s0] sm:$0xff]  ;;  %v72_v3 = vld [vmem:[%s918_s2 + $0x8] sm:$0xff]  ;;  %vm691_vm0 = vmmov 0  }
  0x14   :  { %556 = vmatprep.subr.bf16.mxu0 %v690_v0  ;;  %580 = vmatprep.subr.bf16.mxu1 %v690_v0  ;;  %v71_v2 = vld [vmem:[%s918_s2] sm:$0xff]  ;;  %v49_v4 = vmul.f32 %v44_v1, %v44_v1  ;;  %v73_v6 = vld [vmem:[%s918_s2 + $0x10] sm:$0xff]  ;;  %v74_v7 = vld [vmem:[%s918_s2 + $0x18] sm:$0xff]  ;;  %v692_v20 = vmov 0.0   ;;  %s693_s22 = smov [#allocation5]   ;;  %vm376_vm1 = vcmask 130048  }
  0x15   :  { %47 = vadd.xlane.f32.xlu0 %v44_v1  ;;  %v557_v5 = vpack.c.bf16 %v72_v3, %v71_v2  ;;  %v560_v8 = vpack.c.bf16 %v74_v7, %v73_v6  ;;  %v75_v9 = vld [vmem:[%s918_s2 + $0x20] sm:$0xff]  ;;  %v76_v10 = vld [vmem:[%s918_s2 + $0x28] sm:$0xff]  ;;  %v77_v12 = vld [vmem:[%s918_s2 + $0x30] sm:$0xff]  ;;  %483 = vmatprep.mubr.msk.f32.mxu0 %vm691_vm0, %v692_v20  ;;  %s384_s23 = sshll.u32 %s693_s22, 4  ;;  %s385_s23 = int_to_ptr.vmem [resolvable:$true] %s384_s23 }
  0x16   :  { %v563_v11 = vpack.c.bf16 %v76_v10, %v75_v9  ;;  %v78_v13 = vld [vmem:[%s918_s2 + $0x38] sm:$0xff]  ;;  %v79_v15 = vld [vmem:[%s918_s2 + $0x40] sm:$0xff]  ;;  %v80_v16 = vld [vmem:[%s918_s2 + $0x48] sm:$0xff]  ;;  %518 = vmatprep.mubr.msk.f32.mxu1 %vm691_vm0, %v692_v20  ;;  %p666_p9 = scmp.lt.s32.totalorder %s385_s23, %s385_s23 }
  0x17   :  { %558 = vmatpush3.bf16.msra.mxu0 %v557_v5  ;;  %v566_v14 = vpack.c.bf16 %v78_v13, %v77_v12  ;;  %v569_v17 = vpack.c.bf16 %v80_v16, %v79_v15  ;;  %v81_v18 = vld [vmem:[%s918_s2 + $0x50] sm:$0xff]  ;;  %v82_v19 = vld [vmem:[%s918_s2 + $0x58] sm:$0xff]  ;;  %v83_v22 = vld [vmem:[%s918_s2 + $0x60] sm:$0xff] }
  0x18   :  { %559 = vmatprep.subr.bf16.mxu0 %v690_v0  ;;  %v572_v21 = vpack.c.bf16 %v82_v19, %v81_v18  ;;  %v84_v23 = vld [vmem:[%s918_s2 + $0x68] sm:$0xff]  ;;  %v85_v25 = vld [vmem:[%s918_s2 + $0x70] sm:$0xff]  ;;  %v86_v26 = vld [vmem:[%s918_s2 + $0x78] sm:$0xff] }
  0x19   :  { %50 = vadd.xlane.f32.xlu0 %v49_v4  ;;  %v575_v24 = vpack.c.bf16 %v84_v23, %v83_v22  ;;  %v578_v27 = vpack.c.bf16 %v86_v26, %v85_v25  ;;  %v393_v38 = vld [vmem:[%s917_s1] ss:$0 sm:$0xff]  ;;  %v394_v40 = vld [vmem:[%s917_s1 + $0x1] ss:$0 sm:$0xff]  ;;  %v190_v44 = vld [vmem:[#allocation2 + $0x8] sm:$0xff] }
  0x1a   :  { %v189_v43 = vld [vmem:[#allocation2] sm:$0xff]  ;;  %v191_v52 = vld [vmem:[#allocation2 + $0x10] sm:$0xff]  ;;  %v192_v53 = vld [vmem:[#allocation2 + $0x18] sm:$0xff] }
  0x1b   :  { %561 = vmatpush3.bf16.msra.mxu0 %v560_v8  ;;  %v581_v45 = vpack.c.bf16 %v190_v44, %v189_v43  ;;  %v395_v46 = vld [vmem:[%s919_s3 + $0x2] ss:$0 sm:$0xff]  ;;  %v584_v54 = vpack.c.bf16 %v192_v53, %v191_v52  ;;  %v194_v56 = vld [vmem:[#allocation2 + $0x28] sm:$0xff]  ;;  %v195_v58 = vld [vmem:[#allocation2 + $0x30] sm:$0xff] }
  0x1c   :  { %562 = vmatprep.subr.bf16.mxu0 %v690_v0  ;;  %v193_v55 = vld [vmem:[#allocation2 + $0x20] sm:$0xff]  ;;  %v196_v59 = vld [vmem:[#allocation2 + $0x38] sm:$0xff]  ;;  %v198_v62 = vld [vmem:[#allocation2 + $0x48] sm:$0xff] }
  0x1d   :  { %582 = vmatpush3.bf16.msra.mxu1 %v581_v45  ;;  %v587_v57 = vpack.c.bf16 %v194_v56, %v193_v55  ;;  %v590_v60 = vpack.c.bf16 %v196_v59, %v195_v58  ;;  %v197_v61 = vld [vmem:[#allocation2 + $0x40] sm:$0xff]  ;;  %v200_v2 = vld [vmem:[#allocation2 + $0x58] sm:$0xff]  ;;  %v202_v5 = vld [vmem:[#allocation2 + $0x68] sm:$0xff] }
  0x1e   :  { %583 = vmatprep.subr.bf16.mxu1 %v690_v0  ;;  %v593_v63 = vpack.c.bf16 %v198_v62, %v197_v61  ;;  %v201_v4 = vld [vmem:[#allocation2 + $0x60] sm:$0xff]  ;;  %v203_v7 = vld [vmem:[#allocation2 + $0x70] sm:$0xff]  ;;  %v204_v8 = vld [vmem:[#allocation2 + $0x78] sm:$0xff] }
  0x1f   :  { %564 = vmatpush3.bf16.msra.mxu0 %v563_v11  ;;  %v599_v6 = vpack.c.bf16 %v202_v5, %v201_v4  ;;  %v602_v9 = vpack.c.bf16 %v204_v8, %v203_v7  ;;  %v283_v10 = vld [vmem:[%s922_s6] sm:$0xff]  ;;  %v284_v11 = vld [vmem:[%s922_s6 + $0x8] sm:$0xff]  ;;  %v285_v12 = vld [vmem:[%s922_s6 + $0x10] sm:$0xff] }
  0x20   :  { %565 = vmatprep.subr.bf16.mxu0 %v690_v0  ;;  %v605_v13 = vpack.c.bf16 %v284_v11, %v283_v10  ;;  %v287_v16 = vld [vmem:[%s922_s6 + $0x20] sm:$0xff]  ;;  %v289_v19 = vld [vmem:[%s922_s6 + $0x30] sm:$0xff]  ;;  %v292_v23 = vld [vmem:[%s922_s6 + $0x48] sm:$0xff] }
  0x21   :  { %585 = vmatpush3.bf16.msra.mxu1 %v584_v54  ;;  %v291_v22 = vld [vmem:[%s922_s6 + $0x40] sm:$0xff]  ;;  %v293_v25 = vld [vmem:[%s922_s6 + $0x50] sm:$0xff]  ;;  %v294_v26 = vld [vmem:[%s922_s6 + $0x58] sm:$0xff] }
  0x22   :  { %586 = vmatprep.subr.bf16.mxu1 %v690_v0  ;;  %v297_v45 = vld [vmem:[%s922_s6 + $0x70] sm:$0xff]  ;;  %v399_v53 = vld [vmem:[%s923_s7] ss:$0 sm:$0xff] }
  0x23   :  { %567 = vmatpush3.bf16.msra.mxu0 %v566_v14  ;;  %v286_v14 = vld [vmem:[%s922_s6 + $0x18] sm:$0xff] }
  0x24   :  { %568 = vmatprep.subr.bf16.mxu0 %v690_v0  ;;  %v608_v15 = vpack.c.bf16 %v286_v14, %v285_v12 }
  0x25   :  { %588 = vmatpush3.bf16.msra.mxu1 %v587_v57 }
  0x26   :  { %589 = vmatprep.subr.bf16.mxu1 %v690_v0 }
  0x27   :  { %570 = vmatpush3.bf16.msra.mxu0 %v569_v17  ;;  %v288_v17 = vld [vmem:[%s922_s6 + $0x28] sm:$0xff] }
  0x28   :  { %571 = vmatprep.subr.bf16.mxu0 %v690_v0  ;;  %v611_v18 = vpack.c.bf16 %v288_v17, %v287_v16 }
  0x29   :  { %591 = vmatpush3.bf16.msra.mxu1 %v590_v60 }
  0x2a   :  { %592 = vmatprep.subr.bf16.mxu1 %v690_v0 }
  0x2b   :  { %573 = vmatpush3.bf16.msra.mxu0 %v572_v21 }
  0x2c   :  { %574 = vmatprep.subr.bf16.mxu0 %v690_v0 }
  0x2d   :  { %594 = vmatpush3.bf16.msra.mxu1 %v593_v63 }
  0x2e   :  { %595 = vmatprep.subr.bf16.mxu1 %v690_v0 }
  0x2f   :  { %576 = vmatpush3.bf16.msra.mxu0 %v575_v24  ;;  %v617_v24 = vpack.c.bf16 %v292_v23, %v291_v22 }
  0x30   :  { %577 = vmatprep.subr.bf16.mxu0 %v690_v0 }
  0x33   :  { %579 = vmatpush3.bf16.msra.mxu0 %v578_v27  ;;  %v620_v27 = vpack.c.bf16 %v294_v26, %v293_v25 }
  0x34   :  { %604 = vmatprep.subr.bf16.mxu0 %v690_v0 }
  0xa2   :  { %v48_v28 = vpop.xlane.xlu0 %47 }
  0xa3   :  { %v52_v29 = vmul.f32 0.03125, %v48_v28  ;;  %v295_v28 = vld [vmem:[%s922_s6 + $0x60] sm:$0xff] }
  0xa5   :  { %v54_v31 = vmul.f32 %v52_v29, %v52_v29  ;;  %v57_v36 = vsub.f32 %v44_v1, %v52_v29  ;;  %v199_v1 = vld [vmem:[#allocation2 + $0x50] sm:$0xff]  ;;  %v296_v29 = vld [vmem:[%s922_s6 + $0x68] sm:$0xff] }
  0xa6   :  { %v51_v30 = vpop.xlane.xlu0 %50  ;;  %v596_v3 = vpack.c.bf16 %v200_v2, %v199_v1 }
  0xa7   :  { %v53_v32 = vmul.f32 0.03125, %v51_v30  ;;  %v623_v30 = vpack.c.bf16 %v296_v29, %v295_v28 }
  0xa8   :  { %597 = vmatpush3.bf16.msra.mxu1 %v596_v3 }
  0xa9   :  { %v55_v33 = vsub.f32 %v53_v32, %v54_v31  ;;  %598 = vmatprep.subr.bf16.mxu1 %v690_v0 }
  0xab   :  { %v56_v34 = vmax.f32 %v55_v33, 0.0 }
  0xac   :  { %600 = vmatpush3.bf16.msra.mxu1 %v599_v6 }
  0xad   :  { %v58_v35 = vadd.f32 1e-05, %v56_v34  ;;  %601 = vmatprep.subr.bf16.mxu1 %v690_v0 }
  0xaf   :  { %635 = vrsqrt.f32 %v58_v35 }
  0xb0   :  { %603 = vmatpush3.bf16.msra.mxu1 %v602_v9 }
  0xb9   :  { %v636_v37 = vpop.eup %635 }
  0xba   :  { %v60_v39 = vmul.f32 %v636_v37, %v57_v36 }
  0xbc   :  { %v65_v41 = vmul.f32 %v393_v38, %v60_v39 }
  0xbe   :  { %v70_v42 = vadd.f32 %v394_v40, %v65_v41  ;;  %v396_v41 = vld [vmem:[%s919_s3] ss:$0 sm:$0xff] }
  0xc0   :  { %484 = vmatmul.mubr.f32.vlgmr.msra.gmra.mrb[0].mxu0 %v70_v42 }
  0xc1   :  { %553 = vmatprep.mubr.msk.f32.mxu0 %vm691_vm0, %v692_v20  ;;  %606 = vmatpush3.bf16.msra.mxu0 %v605_v13  ;;  %v290_v20 = vld [vmem:[%s922_s6 + $0x38] sm:$0xff] }
  0xc2   :  { %607 = vmatprep.subr.bf16.mxu0 %v690_v0  ;;  %v614_v21 = vpack.c.bf16 %v290_v20, %v289_v19 }
  0xc5   :  { %609 = vmatpush3.bf16.msra.mxu0 %v608_v15 }
  0xc6   :  { %610 = vmatprep.subr.bf16.mxu0 %v690_v0 }
  0xc9   :  { %612 = vmatpush3.bf16.msra.mxu0 %v611_v18 }
  0xca   :  { %613 = vmatprep.subr.bf16.mxu0 %v690_v0 }
  0xcd   :  { %615 = vmatpush3.bf16.msra.mxu0 %v614_v21 }
  0xce   :  { %616 = vmatprep.subr.bf16.mxu0 %v690_v0 }
  0xd1   :  { %618 = vmatpush3.bf16.msra.mxu0 %v617_v24 }
  0xd2   :  { %619 = vmatprep.subr.bf16.mxu0 %v690_v0 }
  0xd5   :  { %621 = vmatpush3.bf16.msra.mxu0 %v620_v27 }
  0xd6   :  { %622 = vmatprep.subr.bf16.mxu0 %v690_v0 }
  0xd9   :  { %624 = vmatpush3.bf16.msra.mxu0 %v623_v30 }
  0xda   :  { %625 = vmatprep.subr.bf16.mxu0 %v690_v0  ;;  %v397_v0 = vld [vmem:[%s919_s3 + $0x1] ss:$0 sm:$0xff] }
 0x193   :  { %v158_v47 = vpop.f32.mrb[0].mxu0 }
 0x194   :  { %v159_v48 = vadd.f32 %v395_v46, %v158_v47  ;;  %v485_v49 = vpop.f32.mrb[1].mxu0  ;;  %v298_v46 = vld [vmem:[%s922_s6 + $0x78] sm:$0xff]  ;;  %s661_s6 = scalar_lea.vmem %s385_s23, 128 }
 0x195   :  { %v626_v47 = vpack.c.bf16 %v298_v46, %v297_v45  ;;  %p662_p8 = scmp.ne.s32.totalorder %s385_s23, %s661_s6  ;;  %p667_p10 = scmp.lt.s32.totalorder %s661_s6, %s661_s6 }
 0x196   :  { %v825_v50 = vmax.f32 %v159_v48, 0.0  ;;  %v398_v48 = vld [vmem:[%s921_s5] ss:$0 sm:$0xff] }
 0x197   :  { %627 = vmatpush3.bf16.msra.mxu0 %v626_v47  ;;  %p668_p11 = por %p667_p10, %p666_p9 }
 0x198   :  { %165 = vadd.xlane.f32.xlu1 %v825_v50  ;;  %v167_v51 = vmul.f32 %v825_v50, %v825_v50 }
 0x199   :  { %p669_p12 = pnand %p668_p11, %p662_p8 }
 0x19c   :  { %168 = vadd.xlane.f32.xlu1 %v167_v51 }
 0x225   :  { %v166_v31 = vpop.xlane.xlu1 %165 }
 0x226   :  { %v170_v32 = vmul.f32 0.015625, %v166_v31 }
 0x228   :  { %v172_v34 = vmul.f32 %v170_v32, %v170_v32  ;;  %v175_v39 = vsub.f32 %v825_v50, %v170_v32 }
 0x229   :  { %v169_v33 = vpop.xlane.xlu1 %168 }
 0x22a   :  { %v171_v35 = vmul.f32 0.015625, %v169_v33 }
 0x22c   :  { %v173_v36 = vsub.f32 %v171_v35, %v172_v34 }
 0x22e   :  { %v174_v37 = vmax.f32 %v173_v36, 0.0 }
 0x230   :  { %v176_v38 = vadd.f32 1e-05, %v174_v37 }
 0x232   :  { %637 = vrsqrt.f32 %v176_v38 }
 0x23c   :  { %v638_v40 = vpop.eup %637 }
 0x23d   :  { %v178_v42 = vmul.f32 %v638_v40, %v175_v39 }
 0x23f   :  { %v183_v43 = vmul.f32 %v396_v41, %v178_v42 }
 0x241   :  { %v188_v44 = vadd.f32 %v397_v0, %v183_v43 }
 0x243   :  { %519 = vmatmul.mubr.f32.vlgmr.msra.gmra.mrb[0].mxu1 %v188_v44 }
 0x316   :  { %v278_v49 = vpop.f32.mrb[0].mxu1 }
 0x317   :  { %v279_v50 = vadd.f32 %v398_v48, %v278_v49  ;;  %v520_v51 = vpop.f32.mrb[1].mxu1 }
 0x319   :  { %v282_v52 = vmax.f32 %v279_v50, 0.0 }
 0x31b   :  { %554 = vmatmul.mubr.f32.vlgmr.msra.gmra.mrb[2].mxu0 %v282_v52 }
 0x3ee   :  { %v372_v54 = vpop.f32.mrb[2].mxu0 }
 0x3ef   :  { %v373_v55 = vadd.f32 %v399_v53, %v372_v54  ;;  %v555_v56 = vpop.f32.mrb[3].mxu0 }
 0x3f1   :  { %377 = vst.msk [vmem:[#allocation5] sm:$0xff] %vm376_vm1, %v373_v55 }
 0x3f2   :  { %672 = shalt.err (!%p669_p12)
}
 0x3f3   :  { %s673_s4 = scalar_lea.hbm %s924_s8, 128 }
 0x3f4   :  { %p674_p13 = scmp.ne.s32.totalorder %s924_s8, %s673_s4  ;;  %p677_p0 = scmp.lt.u32.totalorder %s673_s4, %s924_s8 }
 0x3f6   :  { %p679_p1 = pnand %p677_p0, %p674_p13 }
 0x3f8   :  { %682 = shalt.err (!%p679_p1)
}
 0x3f9   :  { %387 = dma.vmem_to_hbm [thread:$0]  %s385_s23, 128, %s924_s8, [#allocation4]  }
 0x3fa   :  { %685 = dma.done.wait [#allocation4], 128  }
 0x3fb   :  { %686 = vsyncadd [#allocation4], 4294967168 }
 0x3fc   :  { %391 = vsyncpa [#allocation3], 1 }
 0x3fd   :  { %392 = vsyncpa [#allocation4], 1 }

</bundles_post_ra>
